<compile_context>
chip_gen: v7x
topology: tpu7x:2x2x1
jax: 0.10.0
libtpu: 0.0.40
codegen_flags: <defaults>
</compile_context>

<pallas_src>
import numpy as np
import jax
import jax.numpy as jnp
from jax.experimental import pallas as pl
from jax.experimental.pallas import tpu as pltpu


def _bilinear_matrix(n_in, n_out):
    """(n_out, n_in) interpolation matrix for Upsample(bilinear, align_corners=True)."""
    A = np.zeros((n_out, n_in), np.float32)
    if n_in == 1:
        A[:, 0] = 1.0
        return A
    scale = (n_in - 1) / (n_out - 1)
    for o in range(n_out):
        src = o * scale
        i0 = min(int(np.floor(src)), n_in - 1)
        i1 = min(i0 + 1, n_in - 1)
        f = src - i0
        A[o, i0] += 1.0 - f
        A[o, i1] += f
    return A


def _inconv_kernel(x_ref, ahp_ref, k1_ref, b1_ref, k2_ref, b2_ref, out_ref, h1p_ref):
    # Block shapes:
    #   x_ref   (1, Hi, Wi*Cin)        ahp_ref (Ho+2, Hi)
    #   k1_ref  (3, Wi*Cin, Wo*Cout)   b1_ref  (1, Wo*Cout)
    #   k2_ref  (3, Wo*Cout, Wo*Cout)  b2_ref  (1, Wo*Cout)
    #   out_ref (1, Ho, Wo*Cout)       h1p_ref (Ho+2, Wo*Cout) VMEM scratch
    Ho = out_ref.shape[1]
    N = out_ref.shape[2]                       # Wo*Cout, lane-dense

    x2d = x_ref[0]                             # (Hi, Wi*Cin)

    # --- bilinear H-upsample (align_corners=True); the conv-1 zero halo rows
    #     come for free from the zero rows folded into A_h_pad.
    r1p = jnp.dot(ahp_ref[...], x2d,
                  preferred_element_type=jnp.float32)          # (Ho+2, Wi*Cin)

    # --- conv #1 (3x3, pad=1) + ReLU: W-upsample, dx taps and W padding are
    #     folded into K1[dy] -> just 3 dense MXU matmuls, no im2col copies.
    acc = None
    for dy in range(3):
        t = jnp.dot(r1p[dy:dy + Ho, :], k1_ref[dy],
                    preferred_element_type=jnp.float32)        # (Ho, N)
        acc = t if acc is None else acc + t
    h1 = jnp.maximum(acc + b1_ref[...], 0.0)                   # (Ho, N)

    # Stage conv-2 input with its H zero halo.  Only the two 1-row halos are
    # written with zeros (cheap and safe under "parallel" batch sharding);
    # the interior is fully overwritten every step -> no full-buffer zeroing.
    zrow = jnp.zeros((1, N), jnp.float32)
    h1p_ref[0:1, :] = zrow
    h1p_ref[Ho + 1:Ho + 2, :] = zrow
    h1p_ref[1:Ho + 1, :] = h1

    # --- conv #2 (3x3, pad=1) + ReLU
    acc2 = None
    for dy in range(3):
        t = jnp.dot(h1p_ref[dy:dy + Ho, :], k2_ref[dy],
                    preferred_element_type=jnp.float32)        # (Ho, N)
        acc2 = t if acc2 is None else acc2 + t
    out_ref[0] = jnp.maximum(acc2 + b2_ref[...], 0.0).astype(out_ref.dtype)


@jax.jit
def inconv_forward(x_nchw, w1, b1, w2, b2):
    """x_nchw: (B, Cin, H, W); w1 (3,3,Cin,Cout), w2 (3,3,Cout,Cout) HWIO; biases (1, Cout)."""
    B, Cin, Hi, Wi = x_nchw.shape
    Cout = w1.shape[-1]
    Ho, Wo = 2 * Hi, 2 * Wi
    N = Wo * Cout

    # NCHW -> NHWC -> (B, Hi, Wi*Cin): lane-dense, one row per input image row.
    # TODO(synk): accept/produce NHWC directly to drop these boundary transposes.
    x = jnp.transpose(x_nchw, (0, 2, 3, 1)).reshape(B, Hi, Wi * Cin)

    # --- static interpolation matrices (built at trace time with numpy) -----
    ah = _bilinear_matrix(Hi, Ho)                          # (Ho, Hi)
    ah_pad = np.zeros((Ho + 2, Hi), np.float32)
    ah_pad[1:Ho + 1] = ah                                  # zero halo rows folded in

    aw = _bilinear_matrix(Wi, Wo)                          # (Wo, Wi)
    aw_ext = np.zeros((Wo + 2, Wi), np.float32)
    aw_ext[1:Wo + 1] = aw
    # A1[W, dx, w] = weight of source column w in padded upsampled column W+dx
    A1 = np.stack([aw_ext[dx:dx + Wo, :] for dx in range(3)], axis=1)   # (Wo, 3, Wi)
    # E[W, dx, w'] = 1 iff conv-2 tap (W, dx) reads valid conv-1 column w'
    E = np.zeros((Wo, 3, Wo), np.float32)
    for dx in range(3):
        for wq in range(Wo):
            j = wq + dx - 1
            if 0 <= j < Wo:
                E[wq, dx, j] = 1.0

    hp = jax.lax.Precision.HIGHEST
    # K1[dy]: (Wi*Cin, Wo*Cout) — W-upsample + conv1 dx taps + W zero padding.
    k1 = jnp.einsum('Wxw,dxio->dwiWo', jnp.asarray(A1), w1,
                    precision=hp).reshape(3, Wi * Cin, N)
    # K2[dy]: (Wo*Cout, Wo*Cout) — conv2 dx taps + W zero padding.
    k2 = jnp.einsum('WxV,dxio->dViWo', jnp.asarray(E), w2,
                    precision=hp).reshape(3, N, N)
    b1t = jnp.tile(b1.reshape(1, Cout), (1, Wo))           # (1, Wo*Cout)
    b2t = jnp.tile(b2.reshape(1, Cout), (1, Wo))

    out3d = pl.pallas_call(
        _inconv_kernel,
        out_shape=jax.ShapeDtypeStruct((B, Ho, N), x_nchw.dtype),
        grid_spec=pltpu.PrefetchScalarGridSpec(
            num_scalar_prefetch=0,
            grid=(B,),
            in_specs=[
                pl.BlockSpec((1, Hi, Wi * Cin), lambda b: (b, 0, 0)),
                pl.BlockSpec((Ho + 2, Hi), lambda b: (0, 0)),
                pl.BlockSpec((3, Wi * Cin, N), lambda b: (0, 0, 0)),
                pl.BlockSpec((1, N), lambda b: (0, 0)),
                pl.BlockSpec((3, N, N), lambda b: (0, 0, 0)),
                pl.BlockSpec((1, N), lambda b: (0, 0)),
            ],
            out_specs=pl.BlockSpec((1, Ho, N), lambda b: (b, 0, 0)),
            scratch_shapes=[pltpu.VMEM((Ho + 2, N), jnp.float32)],
        ),
        compiler_params=pltpu.CompilerParams(
            dimension_semantics=("parallel",),
            vmem_limit_bytes=32 * 1024 * 1024),
    )(x, jnp.asarray(ah_pad), k1, b1t, k2, b2t)

    out_nhwc = out3d.reshape(B, Ho, Wo, Cout)
    return jnp.transpose(out_nhwc, (0, 3, 1, 2))            # NHWC -> NCHW


def _reference_inconv(x, w1, b1, w2, b2):
    """Pure-JAX reference mirroring the PyTorch module (NCHW)."""
    B, C, H, W = x.shape
    Ho, Wo = 2 * H, 2 * W

    def axis_coords(n_in, n_out):
        if n_in == 1:
            z = jnp.zeros((n_out,), jnp.int32)
            return z, z, jnp.zeros((n_out,), jnp.float32)
        src = jnp.arange(n_out, dtype=jnp.float32) * ((n_in - 1) / (n_out - 1))
        i0 = jnp.clip(jnp.floor(src).astype(jnp.int32), 0, n_in - 1)
        i1 = jnp.clip(i0 + 1, 0, n_in - 1)
        f = src - i0.astype(jnp.float32)
        return i0, i1, f

    hi0, hi1, hf = axis_coords(H, Ho)
    wi0, wi1, wf = axis_coords(W, Wo)
    xr = (x[:, :, hi0, :] * (1.0 - hf)[None, None, :, None]
          + x[:, :, hi1, :] * hf[None, None, :, None])
    up = (xr[:, :, :, wi0] * (1.0 - wf)[None, None, None, :]
          + xr[:, :, :, wi1] * wf[None, None, None, :])

    def conv3x3(t, w_hwio, bias):
        w_oihw = jnp.transpose(w_hwio, (3, 2, 0, 1))
        y = jax.lax.conv_general_dilated(
            t, w_oihw, window_strides=(1, 1), padding=((1, 1), (1, 1)),
            dimension_numbers=("NCHW", "OIHW", "NCHW"),
            precision=jax.lax.Precision.HIGHEST)
        return y + bias.reshape(1, -1, 1, 1)

    h = jnp.maximum(conv3x3(up, w1, b1), 0.0)
    return jnp.maximum(conv3x3(h, w2, b2), 0.0)


if __name__ == "__main__":
    B, Cin, H, W = 2, 4, 16, 16
    Cout = 8

    key = jax.random.PRNGKey(0)
    kx, k1, k2, k3, k4 = jax.random.split(key, 5)

    x = jax.random.normal(kx, (B, Cin, H, W), jnp.float32)
    # Deterministic "init" mimicking small conv weights (HWIO layout).
    w1 = jax.random.normal(k1, (3, 3, Cin, Cout), jnp.float32) * (1.0 / (3.0 * Cin ** 0.5))
    b1 = jax.random.normal(k2, (1, Cout), jnp.float32) * 0.05
    w2 = jax.random.normal(k3, (3, 3, Cout, Cout), jnp.float32) * (1.0 / (3.0 * Cout ** 0.5))
    b2 = jax.random.normal(k4, (1, Cout), jnp.float32) * 0.05

    out = inconv_forward(x, w1, b1, w2, b2)
    out = jax.block_until_ready(out)

    ref = _reference_inconv(x, w1, b1, w2, b2)
    assert out.shape == (B, Cout, 2 * H, 2 * W), out.shape
    max_err = float(jnp.max(jnp.abs(out - ref)))
    assert jnp.allclose(out, ref, atol=1e-3, rtol=1e-3), max_err

    print("KERNEL_OK")
</pallas_src>

<mosaic_0001>
module attributes {stable_mosaic.version = 11 : i64} {
  func.func @_inconv_kernel(%arg0: i32, %arg1: memref<1x16x64xf32, #tpu.memory_space<vmem>>, %arg2: memref<34x16xf32, #tpu.memory_space<vmem>>, %arg3: memref<3x64x256xf32, #tpu.memory_space<vmem>>, %arg4: memref<1x256xf32, #tpu.memory_space<vmem>>, %arg5: memref<3x256x256xf32, #tpu.memory_space<vmem>>, %arg6: memref<1x256xf32, #tpu.memory_space<vmem>>, %arg7: memref<1x32x256xf32, #tpu.memory_space<vmem>>, %arg8: memref<34x256xf32, #tpu.memory_space<vmem>>) attributes {dimension_semantics = [#tpu.dimension_semantics<parallel>], iteration_bounds = array<i64: 2>, scalar_prefetch = 0 : i64, scratch_operands = 1 : i64, tpu.core_type = #tpu.core_type<tc>, window_params = [{transform_indices = @transform_0, window_bounds = array<i64: 1, 16, 64>}, {pipeline_mode = #tpu.pipeline_mode<synchronous>, transform_indices = @transform_1, window_bounds = array<i64: 34, 16>}, {pipeline_mode = #tpu.pipeline_mode<synchronous>, transform_indices = @transform_2, window_bounds = array<i64: 3, 64, 256>}, {pipeline_mode = #tpu.pipeline_mode<synchronous>, transform_indices = @transform_3, window_bounds = array<i64: 1, 256>}, {pipeline_mode = #tpu.pipeline_mode<synchronous>, transform_indices = @transform_4, window_bounds = array<i64: 3, 256, 256>}, {pipeline_mode = #tpu.pipeline_mode<synchronous>, transform_indices = @transform_5, window_bounds = array<i64: 1, 256>}, {transform_indices = @transform_6, window_bounds = array<i64: 1, 32, 256>}]} {
    %c0 = arith.constant 0 : index
    %c0_0 = arith.constant 0 : index
    %c0_1 = arith.constant 0 : index
    %0 = vector.load %arg1[%c0, %c0_0, %c0_1] : memref<1x16x64xf32, #tpu.memory_space<vmem>>, vector<1x16x64xf32>
    %1 = vector.shape_cast %0 : vector<1x16x64xf32> to vector<16x64xf32>
    %c0_2 = arith.constant 0 : index
    %c0_3 = arith.constant 0 : index
    %2 = vector.load %arg2[%c0_2, %c0_3] : memref<34x16xf32, #tpu.memory_space<vmem>>, vector<34x16xf32>
    %cst = arith.constant dense<0.000000e+00> : vector<34x64xf32>
    %3 = tpu.matmul %2, %1, %cst {dimension_numbers = #tpu.dot_dimension_numbers<[1], [0], [0], [1], [0, 0, 1, 1], [], []>} : vector<34x16xf32>, vector<16x64xf32>, vector<34x64xf32> -> vector<34x64xf32>
    %4 = vector.extract_strided_slice %3 {offsets = [0, 0], sizes = [32, 64], strides = [1, 1]} : vector<34x64xf32> to vector<32x64xf32>
    %c0_4 = arith.constant 0 : index
    %c0_5 = arith.constant 0 : index
    %c0_6 = arith.constant 0 : index
    %5 = vector.load %arg3[%c0_4, %c0_5, %c0_6] : memref<3x64x256xf32, #tpu.memory_space<vmem>>, vector<1x64x256xf32>
    %6 = vector.shape_cast %5 : vector<1x64x256xf32> to vector<64x256xf32>
    %cst_7 = arith.constant dense<0.000000e+00> : vector<32x256xf32>
    %7 = tpu.matmul %4, %6, %cst_7 {dimension_numbers = #tpu.dot_dimension_numbers<[1], [0], [0], [1], [0, 0, 1, 1], [], []>} : vector<32x64xf32>, vector<64x256xf32>, vector<32x256xf32> -> vector<32x256xf32>
    %8 = vector.extract_strided_slice %3 {offsets = [1, 0], sizes = [32, 64], strides = [1, 1]} : vector<34x64xf32> to vector<32x64xf32>
    %c1 = arith.constant 1 : index
    %c0_8 = arith.constant 0 : index
    %c0_9 = arith.constant 0 : index
    %9 = vector.load %arg3[%c1, %c0_8, %c0_9] : memref<3x64x256xf32, #tpu.memory_space<vmem>>, vector<1x64x256xf32>
    %10 = vector.shape_cast %9 : vector<1x64x256xf32> to vector<64x256xf32>
    %cst_10 = arith.constant dense<0.000000e+00> : vector<32x256xf32>
    %11 = tpu.matmul %8, %10, %cst_10 {dimension_numbers = #tpu.dot_dimension_numbers<[1], [0], [0], [1], [0, 0, 1, 1], [], []>} : vector<32x64xf32>, vector<64x256xf32>, vector<32x256xf32> -> vector<32x256xf32>
    %12 = arith.addf %7, %11 : vector<32x256xf32>
    %13 = vector.extract_strided_slice %3 {offsets = [2, 0], sizes = [32, 64], strides = [1, 1]} : vector<34x64xf32> to vector<32x64xf32>
    %c2 = arith.constant 2 : index
    %c0_11 = arith.constant 0 : index
    %c0_12 = arith.constant 0 : index
    %14 = vector.load %arg3[%c2, %c0_11, %c0_12] : memref<3x64x256xf32, #tpu.memory_space<vmem>>, vector<1x64x256xf32>
    %15 = vector.shape_cast %14 : vector<1x64x256xf32> to vector<64x256xf32>
    %cst_13 = arith.constant dense<0.000000e+00> : vector<32x256xf32>
    %16 = tpu.matmul %13, %15, %cst_13 {dimension_numbers = #tpu.dot_dimension_numbers<[1], [0], [0], [1], [0, 0, 1, 1], [], []>} : vector<32x64xf32>, vector<64x256xf32>, vector<32x256xf32> -> vector<32x256xf32>
    %17 = arith.addf %12, %16 : vector<32x256xf32>
    %c0_14 = arith.constant 0 : index
    %c0_15 = arith.constant 0 : index
    %18 = vector.load %arg4[%c0_14, %c0_15] : memref<1x256xf32, #tpu.memory_space<vmem>>, vector<1x256xf32>
    %19 = vector.broadcast %18 : vector<1x256xf32> to vector<32x256xf32>
    %20 = arith.addf %17, %19 : vector<32x256xf32>
    %cst_16 = arith.constant 0.000000e+00 : f32
    %21 = vector.broadcast %cst_16 : f32 to vector<32x256xf32>
    %22 = arith.maximumf %20, %21 : vector<32x256xf32>
    %cst_17 = arith.constant 0.000000e+00 : f32
    %23 = vector.broadcast %cst_17 : f32 to vector<1x256xf32>
    %c0_18 = arith.constant 0 : index
    %c0_19 = arith.constant 0 : index
    %24 = vector.load %arg8[%c0_18, %c0_19] : memref<34x256xf32, #tpu.memory_space<vmem>>, vector<1x256xf32>
    tpu.vector_store %arg8[%c0_18, %c0_19], %23 {strides = array<i32>} : memref<34x256xf32, #tpu.memory_space<vmem>>, vector<1x256xf32>,
    %c33 = arith.constant 33 : index
    %c0_20 = arith.constant 0 : index
    %25 = vector.load %arg8[%c33, %c0_20] : memref<34x256xf32, #tpu.memory_space<vmem>>, vector<1x256xf32>
    tpu.vector_store %arg8[%c33, %c0_20], %23 {strides = array<i32>} : memref<34x256xf32, #tpu.memory_space<vmem>>, vector<1x256xf32>,
    %c1_21 = arith.constant 1 : index
    %c0_22 = arith.constant 0 : index
    %26 = vector.load %arg8[%c1_21, %c0_22] : memref<34x256xf32, #tpu.memory_space<vmem>>, vector<32x256xf32>
    tpu.vector_store %arg8[%c1_21, %c0_22], %22 {strides = array<i32>} : memref<34x256xf32, #tpu.memory_space<vmem>>, vector<32x256xf32>,
    %c0_23 = arith.constant 0 : index
    %c0_24 = arith.constant 0 : index
    %27 = vector.load %arg8[%c0_23, %c0_24] : memref<34x256xf32, #tpu.memory_space<vmem>>, vector<32x256xf32>
    %c0_25 = arith.constant 0 : index
    %c0_26 = arith.constant 0 : index
    %c0_27 = arith.constant 0 : index
    %28 = vector.load %arg5[%c0_25, %c0_26, %c0_27] : memref<3x256x256xf32, #tpu.memory_space<vmem>>, vector<1x256x256xf32>
    %29 = vector.shape_cast %28 : vector<1x256x256xf32> to vector<256x256xf32>
    %cst_28 = arith.constant dense<0.000000e+00> : vector<32x256xf32>
    %30 = tpu.matmul %27, %29, %cst_28 {dimension_numbers = #tpu.dot_dimension_numbers<[1], [0], [0], [1], [0, 0, 1, 1], [], []>} : vector<32x256xf32>, vector<256x256xf32>, vector<32x256xf32> -> vector<32x256xf32>
    %c1_29 = arith.constant 1 : index
    %c0_30 = arith.constant 0 : index
    %31 = vector.load %arg8[%c1_29, %c0_30] : memref<34x256xf32, #tpu.memory_space<vmem>>, vector<32x256xf32>
    %c1_31 = arith.constant 1 : index
    %c0_32 = arith.constant 0 : index
    %c0_33 = arith.constant 0 : index
    %32 = vector.load %arg5[%c1_31, %c0_32, %c0_33] : memref<3x256x256xf32, #tpu.memory_space<vmem>>, vector<1x256x256xf32>
    %33 = vector.shape_cast %32 : vector<1x256x256xf32> to vector<256x256xf32>
    %cst_34 = arith.constant dense<0.000000e+00> : vector<32x256xf32>
    %34 = tpu.matmul %31, %33, %cst_34 {dimension_numbers = #tpu.dot_dimension_numbers<[1], [0], [0], [1], [0, 0, 1, 1], [], []>} : vector<32x256xf32>, vector<256x256xf32>, vector<32x256xf32> -> vector<32x256xf32>
    %35 = arith.addf %30, %34 : vector<32x256xf32>
    %c2_35 = arith.constant 2 : index
    %c0_36 = arith.constant 0 : index
    %36 = vector.load %arg8[%c2_35, %c0_36] : memref<34x256xf32, #tpu.memory_space<vmem>>, vector<32x256xf32>
    %c2_37 = arith.constant 2 : index
    %c0_38 = arith.constant 0 : index
    %c0_39 = arith.constant 0 : index
    %37 = vector.load %arg5[%c2_37, %c0_38, %c0_39] : memref<3x256x256xf32, #tpu.memory_space<vmem>>, vector<1x256x256xf32>
    %38 = vector.shape_cast %37 : vector<1x256x256xf32> to vector<256x256xf32>
    %cst_40 = arith.constant dense<0.000000e+00> : vector<32x256xf32>
    %39 = tpu.matmul %36, %38, %cst_40 {dimension_numbers = #tpu.dot_dimension_numbers<[1], [0], [0], [1], [0, 0, 1, 1], [], []>} : vector<32x256xf32>, vector<256x256xf32>, vector<32x256xf32> -> vector<32x256xf32>
    %40 = arith.addf %35, %39 : vector<32x256xf32>
    %c0_41 = arith.constant 0 : index
    %c0_42 = arith.constant 0 : index
    %41 = vector.load %arg6[%c0_41, %c0_42] : memref<1x256xf32, #tpu.memory_space<vmem>>, vector<1x256xf32>
    %42 = vector.broadcast %41 : vector<1x256xf32> to vector<32x256xf32>
    %43 = arith.addf %40, %42 : vector<32x256xf32>
    %cst_43 = arith.constant 0.000000e+00 : f32
    %44 = vector.broadcast %cst_43 : f32 to vector<32x256xf32>
    %45 = arith.maximumf %43, %44 : vector<32x256xf32>
    %c0_44 = arith.constant 0 : index
    %c0_45 = arith.constant 0 : index
    %c0_46 = arith.constant 0 : index
    %46 = vector.load %arg7[%c0_44, %c0_45, %c0_46] : memref<1x32x256xf32, #tpu.memory_space<vmem>>, vector<1x32x256xf32>
    %47 = vector.shape_cast %46 : vector<1x32x256xf32> to vector<32x256xf32>
    %48 = vector.shape_cast %45 : vector<32x256xf32> to vector<1x32x256xf32>
    tpu.vector_store %arg7[%c0_44, %c0_45, %c0_46], %48 {strides = array<i32>} : memref<1x32x256xf32, #tpu.memory_space<vmem>>, vector<1x32x256xf32>,
    return
  }
  func.func @transform_0(%arg0: i32) -> (i32, i32, i32) {
    %c0_i32 = arith.constant 0 : i32
    %c0_i32_0 = arith.constant 0 : i32
    %c0_i32_1 = arith.constant 0 : i32
    return %arg0, %c0_i32, %c0_i32_0 : i32, i32, i32
  }
  func.func @transform_1(%arg0: i32) -> (i32, i32) {
    %c0_i32 = arith.constant 0 : i32
    %c0_i32_0 = arith.constant 0 : i32
    %c0_i32_1 = arith.constant 0 : i32
    return %c0_i32, %c0_i32_0 : i32, i32
  }
  func.func @transform_2(%arg0: i32) -> (i32, i32, i32) {
    %c0_i32 = arith.constant 0 : i32
    %c0_i32_0 = arith.constant 0 : i32
    %c0_i32_1 = arith.constant 0 : i32
    %c0_i32_2 = arith.constant 0 : i32
    return %c0_i32, %c0_i32_0, %c0_i32_1 : i32, i32, i32
  }
  func.func @transform_3(%arg0: i32) -> (i32, i32) {
    %c0_i32 = arith.constant 0 : i32
    %c0_i32_0 = arith.constant 0 : i32
    %c0_i32_1 = arith.constant 0 : i32
    return %c0_i32, %c0_i32_0 : i32, i32
  }
  func.func @transform_4(%arg0: i32) -> (i32, i32, i32) {
    %c0_i32 = arith.constant 0 : i32
    %c0_i32_0 = arith.constant 0 : i32
    %c0_i32_1 = arith.constant 0 : i32
    %c0_i32_2 = arith.constant 0 : i32
    return %c0_i32, %c0_i32_0, %c0_i32_1 : i32, i32, i32
  }
  func.func @transform_5(%arg0: i32) -> (i32, i32) {
    %c0_i32 = arith.constant 0 : i32
    %c0_i32_0 = arith.constant 0 : i32
    %c0_i32_1 = arith.constant 0 : i32
    return %c0_i32, %c0_i32_0 : i32, i32
  }
  func.func @transform_6(%arg0: i32) -> (i32, i32, i32) {
    %c0_i32 = arith.constant 0 : i32
    %c0_i32_0 = arith.constant 0 : i32
    %c0_i32_1 = arith.constant 0 : i32
    return %arg0, %c0_i32, %c0_i32_0 : i32, i32, i32
  }
}

</mosaic_0001>

<bundles_post_ra>
// kernel: inconv_forward.1
= control target key start
LH: loop header
LB: loop body
LE: loop exit
PB: predicated region body
PF: predicated region fallthrough
CT: control target
= control target key end

     0   :  { %s2010_s21 = smov 0   ;;  %s2959_s0 = inlined_call_operand.vmem [shape: f32[2,16,64], index: 0, kind: input, shape index: {}]   ;;  %s2960_s1 = inlined_call_operand.vmem [shape: f32[34,16], index: 1, kind: input, shape index: {}]   ;;  %s2961_s2 = inlined_call_operand.vmem [shape: f32[3,64,256], index: 2, kind: input, shape index: {}]   ;;  %s2962_s3 = inlined_call_operand.vmem [shape: f32[1,256], index: 3, kind: input, shape index: {}]   ;;  %s2963_s4 = inlined_call_operand.vmem [shape: f32[3,256,256], index: 4, kind: input, shape index: {}]   ;;  %s2964_s5 = inlined_call_operand.vmem [shape: f32[1,256], index: 5, kind: input, shape index: {}]   ;;  %s2965_s6 = inlined_call_operand.vmem [shape: f32[2,32,256], index: 6, kind: output, shape index: {}]  }
   0x1 LB: > { %s1462_s22 = sadd.s32 4294967295, %s1970_s21   ;;  %p1466_p0 = scmp.ge.s32.totalorder %s1970_s21, 1  ;;  %s1970_s21 = sphi %s2010_s21, %s16_s21  }
   0x2   : > { %p212_p1 = scmp.lt.s32.totalorder %s1970_s21, 3 }
   0x4   : > { %p213_p2 = pnand %p1466_p0, %p212_p1 }
   0x5   : > { %p242_p3 = scmp.lt.s32.totalorder (!%p213_p2), %s1462_s22, 1  ;;  %v1972_v0 = vmov (!%p213_p2), 0.0|0.0   ;;  %vm1973_vm0 = vmmov (!%p213_p2), 0   ;;  %v1974_v1 = vmov (!%p213_p2), 0.0   ;;  %v1477_v2 = vld [vmem:[%s2961_s2 + $0x88] sm:$0xff] (!%p213_p2)  ;;  %v1479_v3 = vld [vmem:[%s2961_s2 + $0x98] sm:$0xff] (!%p213_p2) }
   0x6   : > { %216 = sbr.rel (%p213_p2) target bundleno = 797 (0x31d), region = 44  ;;  %1678 = vmatprep.subr.bf16.mxu1 (!%p213_p2), %v1972_v0  ;;  %1663 = vmatprep.mubr.msk.f32.mxu1 (!%p213_p2), %vm1973_vm0, %v1974_v1  ;;  %v1476_v4 = vld [vmem:[%s2961_s2 + $0x80] sm:$0xff] (!%p213_p2)  ;;  %v1681_v7 = vpack.c.bf16 (!%p213_p2), %v1479_v3, %v1477_v2  ;;  %v1478_v8 = vld [vmem:[%s2961_s2 + $0x90] sm:$0xff] (!%p213_p2)  ;;  %v1481_v10 = vld [vmem:[%s2961_s2 + $0xa8] sm:$0xff] (!%p213_p2)  ;;  %vm259_vm1 = vcmask (!%p213_p2), 130048   ;;  %vm403_vm2 = vcmask (!%p213_p2), 1046528  }
   0x7   : > { %v1483_v11 = vld [vmem:[%s2961_s2 + $0xb8] sm:$0xff] (!%p213_p2)  ;;  %v254_v12 = vld [vmem:[%s2960_s1] sm:$0xff] (!%p213_p2)  ;;  %v1683_v13 = vpack.c.bf16 (!%p213_p2), %v1478_v8, %v1476_v4  ;;  %v1482_v16 = vld [vmem:[%s2961_s2 + $0xb0] sm:$0xff] (!%p213_p2)  ;;  %vm625_vm3 = vcmask (!%p213_p2), 1045504   ;;  %vm413_vm4 = vcmask (!%p213_p2), 523264   ;;  %vm785_vm6 = vcmask (!%p213_p2), 1040384  }
   0x8   : > { %v1685_v14 = vpack.c.bf16 (!%p213_p2), %v1483_v11, %v1481_v10  ;;  %v1480_v15 = vld [vmem:[%s2961_s2 + $0xa0] sm:$0xff] (!%p213_p2)  ;;  %v1485_v17 = vld [vmem:[%s2961_s2 + $0xc8] sm:$0xff] (!%p213_p2)  ;;  %v1487_v18 = vld [vmem:[%s2961_s2 + $0xd8] sm:$0xff] (!%p213_p2) }
   0x9   : > { %v255_v19 = vld [vmem:[%s2960_s1 + $0x8] sm:$0xff] (!%p213_p2)  ;;  %v1687_v20 = vpack.c.bf16 (!%p213_p2), %v1482_v16, %v1480_v15  ;;  %v1689_v21 = vpack.c.bf16 (!%p213_p2), %v1487_v18, %v1485_v17  ;;  %v1484_v22 = vld [vmem:[%s2961_s2 + $0xc0] sm:$0xff] (!%p213_p2)  ;;  %v1486_v23 = vld [vmem:[%s2961_s2 + $0xd0] sm:$0xff] (!%p213_p2) }
   0xa   : > { %v256_v24 = vld [vmem:[%s2960_s1 + $0x10] sm:$0xff] (!%p213_p2)  ;;  %v1691_v25 = vpack.c.bf16 (!%p213_p2), %v1486_v23, %v1484_v22  ;;  %v257_v26 = vld [vmem:[%s2960_s1 + $0x18] sm:$0xff] (!%p213_p2)  ;;  %v258_v27 = vld [vmem:[%s2960_s1 + $0x20] sm:$0x3] (!%p213_p2) }
   0xb   : > { %v1489_v28 = vld [vmem:[%s2961_s2 + $0xe8] sm:$0xff] (!%p213_p2)  ;;  %v1491_v29 = vld [vmem:[%s2961_s2 + $0xf8] sm:$0xff] (!%p213_p2)  ;;  %v1488_v30 = vld [vmem:[%s2961_s2 + $0xe0] sm:$0xff] (!%p213_p2) }
   0xc   : > { %v1693_v31 = vpack.c.bf16 (!%p213_p2), %v1491_v29, %v1489_v28  ;;  %v1490_v32 = vld [vmem:[%s2961_s2 + $0xf0] sm:$0xff] (!%p213_p2)  ;;  %v366_v34 = vld [vmem:[%s2961_s2 + $0x8] sm:$0xff] (!%p213_p2)  ;;  %v368_v35 = vld [vmem:[%s2961_s2 + $0x18] sm:$0xff] (!%p213_p2) }
   0xd   : > { %s2967_s22 = smov (!%p242_p3, %s1462_s22), 1  ;;  %v1695_v33 = vpack.c.bf16 %v1490_v32, %v1488_v30  ;;  %v1697_v36 = vpack.c.bf16 %v368_v35, %v366_v34  ;;  %v829_v37 = vld [vmem:[%s2963_s4 + $0x8] sm:$0xff]  ;;  %v831_v38 = vld [vmem:[%s2963_s4 + $0x18] sm:$0xff]  ;;  %v828_v39 = vld [vmem:[%s2963_s4] sm:$0xff] }
   0xe   : > { %s1650_s27 = sshll.u32 %s2967_s22, 4  ;;  %v1793_v40 = vpack.c.bf16 %v831_v38, %v829_v37  ;;  %v830_v41 = vld [vmem:[%s2963_s4 + $0x10] sm:$0xff]  ;;  %v833_v42 = vld [vmem:[%s2963_s4 + $0x28] sm:$0xff]  ;;  %v835_v43 = vld [vmem:[%s2963_s4 + $0x38] sm:$0xff]  ;;  %s1651_s13 = sshll.u32 %s2967_s22, 6 }
   0xf   : > { %s246_s30 = scalar_lea.vmem %s2959_s0, %s1650_s27  ;;  %v1795_v44 = vpack.c.bf16 %v830_v41, %v828_v39  ;;  %v1797_v45 = vpack.c.bf16 %v835_v43, %v833_v42  ;;  %v832_v46 = vld [vmem:[%s2963_s4 + $0x20] sm:$0xff]  ;;  %v834_v47 = vld [vmem:[%s2963_s4 + $0x30] sm:$0xff]  ;;  %v837_v48 = vld [vmem:[%s2963_s4 + $0x48] sm:$0xff]  ;;  %s2946_s16 = scalar_lea.vmem %s2965_s6, %s1651_s13 }
  0x10   : > { %v252_v5 = vld [vmem:[%s246_s30] sm:$0xff]  ;;  %v253_v6 = vld [vmem:[%s246_s30 + $0x8] sm:$0xff]  ;;  %1794 = vmatprep.subr.bf16.mxu0 %v1793_v40  ;;  %v839_v49 = vld [vmem:[%s2963_s4 + $0x58] sm:$0xff]  ;;  %v1799_v50 = vpack.c.bf16 %v834_v47, %v832_v46 }
  0x11   : > { %v1679_v9 = vpack.c.bf16 %v253_v6, %v252_v5  ;;  %1796 = vmatpush1.bf16.msra.mxu0 %v1795_v44  ;;  %v1801_v51 = vpack.c.bf16 %v839_v49, %v837_v48  ;;  %v836_v52 = vld [vmem:[%s2963_s4 + $0x40] sm:$0xff]  ;;  %v838_v53 = vld [vmem:[%s2963_s4 + $0x50] sm:$0xff]  ;;  %v841_v54 = vld [vmem:[%s2963_s4 + $0x68] sm:$0xff] }
  0x12   : > { %1798 = vmatprep.subr.bf16.mxu0 %v1797_v45  ;;  %v843_v55 = vld [vmem:[%s2963_s4 + $0x78] sm:$0xff]  ;;  %v1803_v56 = vpack.c.bf16 %v838_v53, %v836_v52  ;;  %v840_v58 = vld [vmem:[%s2963_s4 + $0x60] sm:$0xff]  ;;  %v842_v59 = vld [vmem:[%s2963_s4 + $0x70] sm:$0xff] }
  0x13   : > { %1680 = vmatpush3.bf16.msra.mxu1 %v1679_v9  ;;  %v1805_v57 = vpack.c.bf16 %v843_v55, %v841_v54  ;;  %v845_v60 = vld [vmem:[%s2963_s4 + $0x88] sm:$0xff]  ;;  %v847_v61 = vld [vmem:[%s2963_s4 + $0x98] sm:$0xff]  ;;  %v1807_v62 = vpack.c.bf16 %v842_v59, %v840_v58  ;;  %v844_v0 = vld [vmem:[%s2963_s4 + $0x80] sm:$0xff] }
  0x14   : > { %1682 = vmatprep.subr.bf16.mxu1 %v1681_v7  ;;  %v1809_v63 = vpack.c.bf16 %v847_v61, %v845_v60  ;;  %v846_v2 = vld [vmem:[%s2963_s4 + $0x90] sm:$0xff]  ;;  %v849_v3 = vld [vmem:[%s2963_s4 + $0xa8] sm:$0xff]  ;;  %v851_v4 = vld [vmem:[%s2963_s4 + $0xb8] sm:$0xff] }
  0x15   : > { %1800 = vmatpush1.bf16.msra.mxu0 %v1799_v50  ;;  %v1811_v5 = vpack.c.bf16 %v846_v2, %v844_v0  ;;  %v1813_v6 = vpack.c.bf16 %v851_v4, %v849_v3  ;;  %v848_v7 = vld [vmem:[%s2963_s4 + $0xa0] sm:$0xff]  ;;  %v850_v8 = vld [vmem:[%s2963_s4 + $0xb0] sm:$0xff]  ;;  %v853_v9 = vld [vmem:[%s2963_s4 + $0xc8] sm:$0xff] }
  0x16   : > { %1664 = vmatmul.mubr.msk.f32.vlgmr.msra.gmra.mrb[0].mxu1 %vm259_vm1, %v254_v12  ;;  %1802 = vmatprep.subr.bf16.mxu0 %v1801_v51  ;;  %v855_v10 = vld [vmem:[%s2963_s4 + $0xd8] sm:$0xff]  ;;  %v1815_v11 = vpack.c.bf16 %v850_v8, %v848_v7  ;;  %v857_v15 = vld [vmem:[%s2963_s4 + $0xe8] sm:$0xff]  ;;  %v866_v32 = vld [vmem:[%s2963_s4 + $0x130] sm:$0xff] }
  0x17   : > { %1666 = vmatprep.mubr.msk.f32.mxu1 %vm1973_vm0, %v1974_v1  ;;  %1684 = vmatpush1.bf16.msra.mxu1 %v1683_v13  ;;  %v1817_v12 = vpack.c.bf16 %v855_v10, %v853_v9  ;;  %v852_v13 = vld [vmem:[%s2963_s4 + $0xc0] sm:$0xff]  ;;  %v859_v16 = vld [vmem:[%s2963_s4 + $0xf8] sm:$0xff]  ;;  %v870_v38 = vld [vmem:[%s2963_s4 + $0x150] sm:$0xff] }
  0x18   : > { %1686 = vmatprep.subr.bf16.mxu1 %v1685_v14  ;;  %v854_v14 = vld [vmem:[%s2963_s4 + $0xd0] sm:$0xff]  ;;  %v1821_v18 = vpack.c.bf16 %v859_v16, %v857_v15  ;;  %v863_v22 = vld [vmem:[%s2963_s4 + $0x118] sm:$0xff]  ;;  %v868_v37 = vld [vmem:[%s2963_s4 + $0x140] sm:$0xff] }
  0x19   : > { %1804 = vmatpush1.bf16.msra.mxu0 %v1803_v56  ;;  %v1819_v17 = vpack.c.bf16 %v854_v14, %v852_v13  ;;  %v867_v28 = vld [vmem:[%s2963_s4 + $0x138] sm:$0xff]  ;;  %v873_v39 = vld [vmem:[%s2963_s4 + $0x168] sm:$0xff]  ;;  %v1835_v41 = vpack.c.bf16 %v870_v38, %v868_v37  ;;  %v872_v43 = vld [vmem:[%s2963_s4 + $0x160] sm:$0xff] }
  0x1a   : > { %1667 = vmatmul.mubr.msk.f32.gmra.mrb[2].mxu1 %vm259_vm1, %v255_v19  ;;  %1806 = vmatprep.subr.bf16.mxu0 %v1805_v57  ;;  %v856_v19 = vld [vmem:[%s2963_s4 + $0xe0] sm:$0xff]  ;;  %v871_v34 = vld [vmem:[%s2963_s4 + $0x158] sm:$0xff]  ;;  %v874_v44 = vld [vmem:[%s2963_s4 + $0x170] sm:$0xff] }
  0x1b   : > { %1669 = vmatprep.mubr.msk.f32.mxu1 %vm1973_vm0, %v1974_v1  ;;  %1688 = vmatpush1.bf16.msra.mxu1 %v1687_v20  ;;  %v858_v20 = vld [vmem:[%s2963_s4 + $0xf0] sm:$0xff]  ;;  %v875_v40 = vld [vmem:[%s2963_s4 + $0x178] sm:$0xff]  ;;  %v1839_v45 = vpack.c.bf16 %v874_v44, %v872_v43  ;;  %v365_v48 = vld [vmem:[%s2961_s2] sm:$0xff] }
  0x1c   : > { %1690 = vmatprep.subr.bf16.mxu1 %v1689_v21  ;;  %v861_v21 = vld [vmem:[%s2963_s4 + $0x108] sm:$0xff]  ;;  %v1823_v23 = vpack.c.bf16 %v858_v20, %v856_v19  ;;  %v1837_v42 = vpack.c.bf16 %v875_v40, %v873_v39  ;;  %v367_v49 = vld [vmem:[%s2961_s2 + $0x10] sm:$0xff]  ;;  %v372_v51 = vld [vmem:[%s2961_s2 + $0x38] sm:$0xff] }
  0x1d   : > { %1808 = vmatpush1.bf16.msra.mxu0 %v1807_v62  ;;  %v370_v50 = vld [vmem:[%s2961_s2 + $0x28] sm:$0xff]  ;;  %v1699_v53 = vpack.c.bf16 %v367_v49, %v365_v48  ;;  %v369_v60 = vld [vmem:[%s2961_s2 + $0x20] sm:$0xff]  ;;  %v371_v61 = vld [vmem:[%s2961_s2 + $0x30] sm:$0xff] }
  0x1e   : > { %1670 = vmatmul.mubr.msk.f32.gmra.mrb[4].mxu1 %vm259_vm1, %v256_v24  ;;  %1810 = vmatprep.subr.bf16.mxu0 %v1809_v63  ;;  %v1825_v24 = vpack.c.bf16 %v863_v22, %v861_v21  ;;  %v1701_v59 = vpack.c.bf16 %v372_v51, %v370_v50  ;;  %v374_v0 = vld [vmem:[%s2961_s2 + $0x48] sm:$0xff]  ;;  %v376_v2 = vld [vmem:[%s2961_s2 + $0x58] sm:$0xff]  ;;  %v1703_v7 = vpack.c.bf16 %v371_v61, %v369_v60  ;;  %v373_v9 = vld [vmem:[%s2961_s2 + $0x40] sm:$0xff] }
  0x1f   : > { %1672 = vmatprep.mubr.msk.f32.mxu1 %vm1973_vm0, %v1974_v1  ;;  %1692 = vmatpush1.bf16.msra.mxu1 %v1691_v25  ;;  %v860_v25 = vld [vmem:[%s2963_s4 + $0x100] sm:$0xff]  ;;  %v1705_v8 = vpack.c.bf16 %v376_v2, %v374_v0  ;;  %v375_v10 = vld [vmem:[%s2961_s2 + $0x50] sm:$0xff]  ;;  %v380_v13 = vld [vmem:[%s2961_s2 + $0x78] sm:$0xff] }
  0x20   : > { %1694 = vmatprep.subr.bf16.mxu1 %v1693_v31  ;;  %v864_v31 = vld [vmem:[%s2963_s4 + $0x120] sm:$0xff]  ;;  %v1707_v19 = vpack.c.bf16 %v375_v10, %v373_v9  ;;  %v379_v22 = vld [vmem:[%s2961_s2 + $0x70] sm:$0xff]  ;;  %v1507_v37 = vld [vmem:[%s2961_s2 + $0x138] sm:$0xff] }
  0x21   : > { %1812 = vmatpush1.bf16.msra.mxu0 %v1811_v5  ;;  %v1831_v35 = vpack.c.bf16 %v866_v32, %v864_v31  ;;  %v377_v21 = vld [vmem:[%s2961_s2 + $0x60] sm:$0xff]  ;;  %v1509_v43 = vld [vmem:[%s2961_s2 + $0x148] sm:$0xff]  ;;  %v1511_v44 = vld [vmem:[%s2961_s2 + $0x158] sm:$0xff] }
  0x22   : > { %1673 = vmatmul.mubr.msk.f32.gmra.mrb[6].mxu1 %vm259_vm1, %v257_v26  ;;  %1814 = vmatprep.subr.bf16.mxu0 %v1813_v6  ;;  %v862_v26 = vld [vmem:[%s2963_s4 + $0x110] sm:$0xff]  ;;  %v1711_v31 = vpack.c.bf16 %v379_v22, %v377_v21  ;;  %v1508_v48 = vld [vmem:[%s2961_s2 + $0x140] sm:$0xff]  ;;  %v1513_v50 = vld [vmem:[%s2961_s2 + $0x168] sm:$0xff] }
  0x23   : > { %1675 = vmatprep.mubr.msk.f32.mxu1 %vm1973_vm0, %v1974_v1  ;;  %1696 = vmatpush1.bf16.msra.mxu1 %v1695_v33  ;;  %v1827_v29 = vpack.c.bf16 %v862_v26, %v860_v25  ;;  %v869_v33 = vld [vmem:[%s2963_s4 + $0x148] sm:$0xff]  ;;  %v1503_v25 = vld [vmem:[%s2961_s2 + $0x118] sm:$0xff]  ;;  %v1510_v49 = vld [vmem:[%s2961_s2 + $0x150] sm:$0xff] }
  0x24   : > { %1698 = vmatprep.subr.bf16.mxu1 %v1697_v36  ;;  %v1833_v36 = vpack.c.bf16 %v871_v34, %v869_v33  ;;  %v1500_v33 = vld [vmem:[%s2961_s2 + $0x100] sm:$0xff]  ;;  %v1502_v34 = vld [vmem:[%s2961_s2 + $0x110] sm:$0xff]  ;;  %v1723_v51 = vpack.c.bf16 %v1510_v49, %v1508_v48  ;;  %v1525_v61 = vld [vmem:[%s2963_s4 + $0x228] sm:$0xff] }
  0x25   : > { %1816 = vmatpush1.bf16.msra.mxu0 %v1815_v11  ;;  %v1715_v39 = vpack.c.bf16 %v1502_v34, %v1500_v33  ;;  %v1522_v60 = vld [vmem:[%s2963_s4 + $0x210] sm:$0xff]  ;;  %v1528_v9 = vld [vmem:[%s2963_s4 + $0x240] sm:$0xff]  ;;  %v1541_v22 = vld [vmem:[%s2963_s4 + $0x2a8] sm:$0xff] }
  0x26   : > { %1676 = vmatmul.mubr.msk.f32.gmra.mrb[8].mxu1 %vm259_vm1, %v258_v27  ;;  %1818 = vmatprep.subr.bf16.mxu0 %v1817_v12  ;;  %v865_v27 = vld [vmem:[%s2963_s4 + $0x128] sm:$0xff]  ;;  %v1530_v10 = vld [vmem:[%s2963_s4 + $0x250] sm:$0xff]  ;;  %v1559_v48 = vld [vmem:[%s2963_s4 + $0x338] sm:$0xff] }
  0x27   : > { %486 = vmatprep.mubr.f32.mxu1 %v1974_v1  ;;  %v1829_v30 = vpack.c.bf16 %v867_v28, %v865_v27  ;;  %v378_v12 = vld [vmem:[%s2961_s2 + $0x68] sm:$0xff]  ;;  %v1538_v21 = vld [vmem:[%s2963_s4 + $0x290] sm:$0xff] }
  0x28   : > { %v1709_v20 = vpack.c.bf16 %v380_v13, %v378_v12  ;;  %v1739_v12 = vpack.c.bf16 %v1530_v10, %v1528_v9  ;;  %v1546_v33 = vld [vmem:[%s2963_s4 + $0x2d0] sm:$0xff]  ;;  %v1549_v34 = vld [vmem:[%s2963_s4 + $0x2e8] sm:$0xff]  ;;  %v742_v9 = vlaneseq }
  0x29   : > { %1820 = vmatpush1.bf16.msra.mxu0 %v1819_v17  ;;  %v881_v10 = vld [vmem:[%s2963_s4 + $0x1a8] sm:$0xff] }
  0x2a   : > { %1822 = vmatprep.subr.bf16.mxu0 %v1821_v18  ;;  %vm770_vm5 = vcmp.lt.s32.totalorder %v742_v9, 256 }
  0x2b   : > { %772 = vst.msk [vmem:[#allocation2] ss:$8 sm:$0x3] %vm770_vm5, %v1974_v1  ;;  %775 = vst.msk [vmem:[#allocation2 + $0x41] ss:$8 sm:$0x3] %vm770_vm5, %v1974_v1 }
  0x2d   : > { %1824 = vmatpush1.bf16.msra.mxu0 %v1823_v23 }
  0x2e   : > { %1826 = vmatprep.subr.bf16.mxu0 %v1825_v24  ;;  %v1501_v24 = vld [vmem:[%s2961_s2 + $0x108] sm:$0xff] }
  0x2f   : > { %v1713_v32 = vpack.c.bf16 %v1503_v25, %v1501_v24 }
  0x31   : > { %1828 = vmatpush1.bf16.msra.mxu0 %v1827_v29 }
  0x32   : > { %1830 = vmatprep.subr.bf16.mxu0 %v1829_v30 }
  0x35   : > { %1832 = vmatpush1.bf16.msra.mxu0 %v1831_v35 }
  0x36   : > { %1834 = vmatprep.subr.bf16.mxu0 %v1833_v36  ;;  %v1505_v36 = vld [vmem:[%s2961_s2 + $0x128] sm:$0xff] }
  0x37   : > { %v1717_v40 = vpack.c.bf16 %v1507_v37, %v1505_v36 }
  0x39   : > { %1836 = vmatpush1.bf16.msra.mxu0 %v1835_v41  ;;  %v1504_v41 = vld [vmem:[%s2961_s2 + $0x120] sm:$0xff] }
  0x3a   : > { %1838 = vmatprep.subr.bf16.mxu0 %v1837_v42  ;;  %v1506_v42 = vld [vmem:[%s2961_s2 + $0x130] sm:$0xff] }
  0x3d   : > { %1840 = vmatpush1.bf16.msra.mxu0 %v1839_v45  ;;  %v1719_v45 = vpack.c.bf16 %v1506_v42, %v1504_v41  ;;  %v1555_v41 = vld [vmem:[%s2963_s4 + $0x318] sm:$0xff] }
  0xe9   : > { %v2253_v46 = vpop.f32.mrb[0].mxu1 }
  0xea   : > { %v1665_v47 = vpop.f32.mrb[1].mxu1  ;;  %v404_v54 = vrot.slane %v2253_v46, 1  ;;  %v626_v55 = vrot.slane %v2253_v46, 2 }
  0xeb   : > { %v1721_v47 = vpack.c.bf16 %v1511_v44, %v1509_v43  ;;  %v1552_v44 = vld [vmem:[%s2963_s4 + $0x300] sm:$0xff] }
  0xed   : > { %v2267_v52 = vpop.f32.mrb[2].mxu1 }
  0xee   : > { %v405_v56 = vrot.slane %v2267_v52, 1  ;;  %v627_v57 = vrot.slane %v2267_v52, 2  ;;  %v1668_v58 = vpop.f32.mrb[3].mxu1 }
  0xf0   : > { %v406_v62 = vsel %vm403_vm2, %v404_v54, %v405_v56  ;;  %v2281_v63 = vsel %vm625_vm3, %v626_v55, %v627_v57  ;;  %v1512_v54 = vld [vmem:[%s2961_s2 + $0x160] sm:$0xff]  ;;  %v1514_v55 = vld [vmem:[%s2961_s2 + $0x170] sm:$0xff] }
  0xf1   : > { %v2289_v3 = vpop.f32.mrb[4].mxu1  ;;  %1492 = vmatmul.mubr.msk.f32.vlgmr.msra.gmra.mrb[10].mxu1 %vm413_vm4, %v406_v62  ;;  %v1527_v62 = vld [vmem:[%s2963_s4 + $0x238] sm:$0xff] }
  0xf2   : > { %v407_v4 = vrot.slane %v2289_v3, 1  ;;  %v629_v5 = vrot.slane %v2289_v3, 2  ;;  %1700 = vmatpush1.bf16.msra.mxu1 %v1699_v53  ;;  %v1671_v6 = vpop.f32.mrb[5].mxu1  ;;  %492 = vmatprep.mubr.f32.mxu1 %v1974_v1  ;;  %v1733_v2 = vpack.c.bf16 %v1527_v62, %v1525_v61  ;;  %v1565_v61 = vld [vmem:[%s2963_s4 + $0x368] sm:$0xff] }
  0xf3   : > { %1702 = vmatprep.subr.bf16.mxu1 %v1701_v59  ;;  %v1520_v59 = vld [vmem:[%s2963_s4 + $0x200] sm:$0xff]  ;;  %v1531_v6 = vld [vmem:[%s2963_s4 + $0x258] sm:$0xff] }
  0xf4   : > { %v408_v11 = vsel %vm403_vm2, %v405_v56, %v407_v4  ;;  %v2309_v14 = vsel %vm625_vm3, %v627_v57, %v629_v5  ;;  %v1521_v56 = vld [vmem:[%s2963_s4 + $0x208] sm:$0xff]  ;;  %v1727_v57 = vpack.c.bf16 %v1514_v55, %v1512_v54  ;;  %v1731_v0 = vpack.c.bf16 %v1522_v60, %v1520_v59  ;;  %v1563_v55 = vld [vmem:[%s2963_s4 + $0x358] sm:$0xff] }
  0xf5   : > { %v2311_v15 = vpop.f32.mrb[6].mxu1  ;;  %1493 = vmatmul.mubr.msk.f32.gmra.mrb[12].mxu1 %vm413_vm4, %v408_v11  ;;  %v1533_v11 = vld [vmem:[%s2963_s4 + $0x268] sm:$0xff]  ;;  %v879_v60 = vld [vmem:[%s2963_s4 + $0x198] sm:$0xff] }
  0xf6   : > { %v409_v16 = vrot.slane %v2311_v15, 1  ;;  %v631_v17 = vrot.slane %v2311_v15, 2  ;;  %1704 = vmatpush1.bf16.msra.mxu1 %v1703_v7  ;;  %v1674_v18 = vpop.f32.mrb[7].mxu1  ;;  %498 = vmatprep.mubr.f32.mxu1 %v1974_v1  ;;  %v1561_v54 = vld [vmem:[%s2963_s4 + $0x348] sm:$0xff] }
  0xf7   : > { %1706 = vmatprep.subr.bf16.mxu1 %v1705_v8  ;;  %v877_v59 = vld [vmem:[%s2963_s4 + $0x188] sm:$0xff] }
  0xf8   : > { %v410_v23 = vsel %vm403_vm2, %v407_v4, %v409_v16  ;;  %v2331_v26 = vsel %vm625_vm3, %v629_v5, %v631_v17  ;;  %v1526_v4 = vld [vmem:[%s2963_s4 + $0x230] sm:$0xff]  ;;  %v1529_v5 = vld [vmem:[%s2963_s4 + $0x248] sm:$0xff]  ;;  %v1841_v62 = vpack.c.bf16 %v879_v60, %v877_v59 }
  0xf9   : > { %v361_v27 = vpop.f32.mrb[8].mxu1  ;;  %1494 = vmatmul.mubr.msk.f32.gmra.mrb[14].mxu1 %vm413_vm4, %v410_v23  ;;  %v1737_v8 = vpack.c.bf16 %v1531_v6, %v1529_v5  ;;  %v1543_v23 = vld [vmem:[%s2963_s4 + $0x2b8] sm:$0xff]  ;;  %v1564_v5 = vld [vmem:[%s2963_s4 + $0x360] sm:$0xff]  ;;  %v1566_v6 = vld [vmem:[%s2963_s4 + $0x370] sm:$0xff] }
  0xfa   : > { %v411_v28 = vrot.slane %v361_v27, 1  ;;  %v633_v29 = vrot.slane %v361_v27, 2  ;;  %1708 = vmatpush1.bf16.msra.mxu1 %v1707_v19  ;;  %v1677_v30 = vpop.f32.mrb[9].mxu1  ;;  %504 = vmatprep.mubr.f32.mxu1 %v1974_v1  ;;  %v1749_v25 = vpack.c.bf16 %v1543_v23, %v1541_v22  ;;  %v1542_v27 = vld [vmem:[%s2963_s4 + $0x2b0] sm:$0xff]  ;;  %v887_v22 = vld [vmem:[%s2963_s4 + $0x1d8] sm:$0xff]  ;;  %v1573_v23 = vld [vmem:[%s2963_s4 + $0x3a8] sm:$0xff] }
  0xfb   : > { %1710 = vmatprep.subr.bf16.mxu1 %v1709_v20  ;;  %v1536_v20 = vld [vmem:[%s2963_s4 + $0x280] sm:$0xff]  ;;  %1842 = vmatprep.subr.bf16.mxu0 %v1841_v62 }
  0xfc   : > { %v412_v35 = vsel %vm403_vm2, %v409_v16, %v411_v28  ;;  %v2349_v38 = vsel %vm625_vm3, %v631_v17, %v633_v29  ;;  %v1534_v16 = vld [vmem:[%s2963_s4 + $0x270] sm:$0xff]  ;;  %v1537_v17 = vld [vmem:[%s2963_s4 + $0x288] sm:$0xff]  ;;  %v1747_v24 = vpack.c.bf16 %v1538_v21, %v1536_v20  ;;  %v1547_v29 = vld [vmem:[%s2963_s4 + $0x2d8] sm:$0xff] }
  0xfd   : > { %1495 = vmatmul.mubr.msk.f32.gmra.mrb[16].mxu1 %vm413_vm4, %v412_v35  ;;  %v1545_v28 = vld [vmem:[%s2963_s4 + $0x2c8] sm:$0xff]  ;;  %v1551_v35 = vld [vmem:[%s2963_s4 + $0x2f8] sm:$0xff] }
  0xfe   : > { %1712 = vmatpush1.bf16.msra.mxu1 %v1711_v31  ;;  %583 = vmatprep.mubr.f32.mxu1 %v1974_v1  ;;  %v1753_v31 = vpack.c.bf16 %v1547_v29, %v1545_v28  ;;  %v1757_v37 = vpack.c.bf16 %v1551_v35, %v1549_v34  ;;  %v885_v21 = vld [vmem:[%s2963_s4 + $0x1c8] sm:$0xff]  ;;  %v1572_v29 = vld [vmem:[%s2963_s4 + $0x3a0] sm:$0xff] }
  0xff   : > { %1714 = vmatprep.subr.bf16.mxu1 %v1713_v32  ;;  %v1544_v32 = vld [vmem:[%s2963_s4 + $0x2c0] sm:$0xff]  ;;  %v1577_v34 = vld [vmem:[%s2963_s4 + $0x3c8] sm:$0xff] }
 0x100   : > { %v1755_v36 = vpack.c.bf16 %v1546_v33, %v1544_v32  ;;  %v889_v32 = vld [vmem:[%s2963_s4 + $0x1e8] sm:$0xff]  ;;  %v891_v33 = vld [vmem:[%s2963_s4 + $0x1f8] sm:$0xff] }
 0x101   : > { %1496 = vmatmul.mubr.msk.f32.vlgmr.msra.gmra.mrb[10].mxu1 %vm413_vm4, %v2253_v46  ;;  %v1515_v46 = vld [vmem:[%s2961_s2 + $0x178] sm:$0xff]  ;;  %v1853_v35 = vpack.c.bf16 %v891_v33, %v889_v32 }
 0x102   : > { %1716 = vmatpush1.bf16.msra.mxu1 %v1715_v39  ;;  %589 = vmatprep.mubr.f32.mxu1 %v1974_v1  ;;  %v1725_v53 = vpack.c.bf16 %v1515_v46, %v1513_v50  ;;  %v1550_v39 = vld [vmem:[%s2963_s4 + $0x2f0] sm:$0xff]  ;;  %v1556_v46 = vld [vmem:[%s2963_s4 + $0x320] sm:$0xff] }
 0x103   : > { %1718 = vmatprep.subr.bf16.mxu1 %v1717_v40  ;;  %v1553_v40 = vld [vmem:[%s2963_s4 + $0x308] sm:$0xff] }
 0x104   : > { %v1761_v43 = vpack.c.bf16 %v1555_v41, %v1553_v40  ;;  %v1576_v41 = vld [vmem:[%s2963_s4 + $0x3c0] sm:$0xff] }
 0x105   : > { %1497 = vmatmul.mubr.msk.f32.gmra.mrb[12].mxu1 %vm413_vm4, %v2267_v52  ;;  %v1523_v52 = vld [vmem:[%s2963_s4 + $0x218] sm:$0xff] }
 0x106   : > { %1720 = vmatpush1.bf16.msra.mxu1 %v1719_v45  ;;  %595 = vmatprep.mubr.f32.mxu1 %v1974_v1  ;;  %v1729_v58 = vpack.c.bf16 %v1523_v52, %v1521_v56  ;;  %v1554_v45 = vld [vmem:[%s2963_s4 + $0x310] sm:$0xff]  ;;  %v1769_v56 = vpack.c.bf16 %v1563_v55, %v1561_v54  ;;  %v1560_v52 = vld [vmem:[%s2963_s4 + $0x340] sm:$0xff]  ;;  %v2656_v54 = vshrl.u32 %v742_v9, 7 }
 0x107   : > { %1722 = vmatprep.subr.bf16.mxu1 %v1721_v47  ;;  %v1557_v47 = vld [vmem:[%s2963_s4 + $0x328] sm:$0xff]  ;;  %v1763_v49 = vpack.c.bf16 %v1554_v45, %v1552_v44  ;;  %v1587_v45 = vld [vmem:[%s2963_s4 + $0x418] sm:$0xff] }
 0x108   : > { %v1765_v50 = vpack.c.bf16 %v1559_v48, %v1557_v47  ;;  %v1585_v44 = vld [vmem:[%s2963_s4 + $0x408] sm:$0xff]  ;;  %v744_v55 = vsub.s32 0, %v2656_v54 }
 0x109   : > { %1498 = vmatmul.mubr.msk.f32.gmra.mrb[14].mxu1 %vm413_vm4, %v2289_v3  ;;  %v1524_v3 = vld [vmem:[%s2963_s4 + $0x220] sm:$0xff]  ;;  %v1857_v47 = vpack.c.bf16 %v1587_v45, %v1585_v44  ;;  %v1581_v48 = vld [vmem:[%s2963_s4 + $0x3e8] sm:$0xff] }
 0x10a   : > { %1724 = vmatpush1.bf16.msra.mxu1 %v1723_v51  ;;  %601 = vmatprep.mubr.f32.mxu1 %v1974_v1  ;;  %v1735_v7 = vpack.c.bf16 %v1526_v4, %v1524_v3  ;;  %v1558_v51 = vld [vmem:[%s2963_s4 + $0x330] sm:$0xff]  ;;  %v1567_v4 = vld [vmem:[%s2963_s4 + $0x378] sm:$0xff] }
 0x10b   : > { %1726 = vmatprep.subr.bf16.mxu1 %v1725_v53  ;;  %v1767_v53 = vpack.c.bf16 %v1558_v51, %v1556_v46  ;;  %v1582_v46 = vld [vmem:[%s2963_s4 + $0x3f0] sm:$0xff] }
 0x10d   : > { %1499 = vmatmul.mubr.msk.f32.gmra.mrb[16].mxu1 %vm413_vm4, %v2311_v15  ;;  %v1532_v15 = vld [vmem:[%s2963_s4 + $0x260] sm:$0xff] }
 0x10e   : > { %1728 = vmatpush1.bf16.msra.mxu1 %v1727_v57  ;;  %707 = vmatprep.mubr.f32.mxu1 %v1974_v1  ;;  %v1743_v18 = vpack.c.bf16 %v1534_v16, %v1532_v15  ;;  %v1562_v57 = vld [vmem:[%s2963_s4 + $0x350] sm:$0xff]  ;;  %v1571_v16 = vld [vmem:[%s2963_s4 + $0x398] sm:$0xff] }
 0x10f   : > { %1730 = vmatprep.subr.bf16.mxu1 %v1729_v58  ;;  %v1771_v58 = vpack.c.bf16 %v1562_v57, %v1560_v52  ;;  %v882_v15 = vld [vmem:[%s2963_s4 + $0x1b0] sm:$0xff]  ;;  %v748_v52 = vsub.s32 1, %v2656_v54 }
 0x111   : > { %1516 = vmatmul.mubr.msk.f32.vlgmr.msra.gmra.mrb[10].mxu1 %vm413_vm4, %v2281_v63  ;;  %v1535_v63 = vld [vmem:[%s2963_s4 + $0x278] sm:$0xff] }
 0x112   : > { %713 = vmatprep.mubr.f32.mxu1 %v1974_v1  ;;  %1732 = vmatpush1.bf16.msra.mxu1 %v1731_v0  ;;  %v1741_v13 = vpack.c.bf16 %v1535_v63, %v1533_v11  ;;  %v876_v0 = vld [vmem:[%s2963_s4 + $0x180] sm:$0xff]  ;;  %v883_v11 = vld [vmem:[%s2963_s4 + $0x1b8] sm:$0xff]  ;;  %v1569_v63 = vld [vmem:[%s2963_s4 + $0x388] sm:$0xff] }
 0x113   : > { %1734 = vmatprep.subr.bf16.mxu1 %v1733_v2  ;;  %v878_v2 = vld [vmem:[%s2963_s4 + $0x190] sm:$0xff] }
 0x114   : > { %v1843_v3 = vpack.c.bf16 %v878_v2, %v876_v0 }
 0x115   : > { %1517 = vmatmul.mubr.msk.f32.gmra.mrb[12].mxu1 %vm413_vm4, %v2309_v14  ;;  %v1539_v14 = vld [vmem:[%s2963_s4 + $0x298] sm:$0xff] }
 0x116   : > { %719 = vmatprep.mubr.f32.mxu1 %v1974_v1  ;;  %1736 = vmatpush1.bf16.msra.mxu1 %v1735_v7  ;;  %v1745_v19 = vpack.c.bf16 %v1539_v14, %v1537_v17  ;;  %v1773_v7 = vpack.c.bf16 %v1567_v4, %v1565_v61  ;;  %v1777_v14 = vpack.c.bf16 %v1571_v16, %v1569_v63  ;;  %v1586_v16 = vld [vmem:[%s2963_s4 + $0x410] sm:$0xff] }
 0x117   : > { %1738 = vmatprep.subr.bf16.mxu1 %v1737_v8  ;;  %v1775_v8 = vpack.c.bf16 %v1566_v6, %v1564_v5  ;;  %1844 = vmatpush1.bf16.msra.mxu0 %v1843_v3 }
 0x119   : > { %1518 = vmatmul.mubr.msk.f32.gmra.mrb[14].mxu1 %vm413_vm4, %v2331_v26  ;;  %v1540_v26 = vld [vmem:[%s2963_s4 + $0x2a0] sm:$0xff] }
 0x11a   : > { %725 = vmatprep.mubr.f32.mxu1 %v1974_v1  ;;  %1740 = vmatpush1.bf16.msra.mxu1 %v1739_v12  ;;  %v1751_v30 = vpack.c.bf16 %v1542_v27, %v1540_v26  ;;  %v1845_v12 = vpack.c.bf16 %v883_v11, %v881_v10  ;;  %v884_v1 = vld [vmem:[%s2963_s4 + $0x1c0] sm:$0xff]  ;;  %v1575_v26 = vld [vmem:[%s2963_s4 + $0x3b8] sm:$0xff] }
 0x11b   : > { %1742 = vmatprep.subr.bf16.mxu1 %v1741_v13  ;;  %v880_v13 = vld [vmem:[%s2963_s4 + $0x1a0] sm:$0xff]  ;;  %v1781_v28 = vpack.c.bf16 %v1575_v26, %v1573_v23 }
 0x11c   : > { %v1847_v17 = vpack.c.bf16 %v882_v15, %v880_v13  ;;  %1846 = vmatprep.subr.bf16.mxu0 %v1845_v12  ;;  %v1584_v15 = vld [vmem:[%s2963_s4 + $0x400] sm:$0xff] }
 0x11d   : > { %1519 = vmatmul.mubr.msk.f32.gmra.mrb[16].mxu1 %vm413_vm4, %v2349_v38  ;;  %v1548_v38 = vld [vmem:[%s2963_s4 + $0x2e0] sm:$0xff] }
 0x11e   : > { %1744 = vmatpush1.bf16.msra.mxu1 %v1743_v18  ;;  %v1759_v42 = vpack.c.bf16 %v1550_v39, %v1548_v38  ;;  %v1568_v18 = vld [vmem:[%s2963_s4 + $0x380] sm:$0xff]  ;;  %1848 = vmatpush1.bf16.msra.mxu0 %v1847_v17  ;;  %v1579_v38 = vld [vmem:[%s2963_s4 + $0x3d8] sm:$0xff]  ;;  %v1589_v17 = vld [vmem:[%s2963_s4 + $0x428] sm:$0xff] }
 0x11f   : > { %1746 = vmatprep.subr.bf16.mxu1 %v1745_v19  ;;  %v1570_v19 = vld [vmem:[%s2963_s4 + $0x390] sm:$0xff]  ;;  %v1785_v40 = vpack.c.bf16 %v1579_v38, %v1577_v34 }
 0x120   : > { %v1779_v20 = vpack.c.bf16 %v1570_v19, %v1568_v18  ;;  %v1591_v19 = vld [vmem:[%s2963_s4 + $0x438] sm:$0xff] }
 0x121   : > { %v1861_v32 = vpack.c.bf16 %v1591_v19, %v1589_v17  ;;  %v1598_v19 = vld [vmem:[%s2963_s4 + $0x470] sm:$0xff] }
 0x122   : > { %1748 = vmatpush1.bf16.msra.mxu1 %v1747_v24  ;;  %v1849_v24 = vpack.c.bf16 %v887_v22, %v885_v21  ;;  %v2687_v21 = vld [vmem:[%s2963_s4 + $0x430] sm:$0xff] }
 0x123   : > { %1750 = vmatprep.subr.bf16.mxu1 %v1749_v25  ;;  %v886_v25 = vld [vmem:[%s2963_s4 + $0x1d0] sm:$0xff] }
 0x124   : > { %v1851_v27 = vpack.c.bf16 %v886_v25, %v884_v1  ;;  %1850 = vmatprep.subr.bf16.mxu0 %v1849_v24  ;;  %v2695_v24 = vld [vmem:[%s2963_s4 + $0x448] sm:$0xff]  ;;  %v2700_v1 = vld [vmem:[%s2963_s4 + $0x458] sm:$0xff] }
 0x126   : > { %1752 = vmatpush1.bf16.msra.mxu1 %v1751_v30  ;;  %v1574_v30 = vld [vmem:[%s2963_s4 + $0x3b0] sm:$0xff]  ;;  %1852 = vmatpush1.bf16.msra.mxu0 %v1851_v27 }
 0x127   : > { %1754 = vmatprep.subr.bf16.mxu1 %v1753_v31  ;;  %v1783_v31 = vpack.c.bf16 %v1574_v30, %v1572_v29  ;;  %1854 = vmatprep.subr.bf16.mxu0 %v1853_v35 }
 0x12a   : > { %1756 = vmatpush1.bf16.msra.mxu1 %v1755_v36  ;;  %v888_v36 = vld [vmem:[%s2963_s4 + $0x1e0] sm:$0xff] }
 0x12b   : > { %1758 = vmatprep.subr.bf16.mxu1 %v1757_v37  ;;  %v890_v37 = vld [vmem:[%s2963_s4 + $0x1f0] sm:$0xff] }
 0x12c   : > { %v1855_v39 = vpack.c.bf16 %v890_v37, %v888_v36  ;;  %v1865_v37 = vpack.c.bf16 %v2700_v1, %v2695_v24  ;;  %v1603_v24 = vld [vmem:[%s2963_s4 + $0x498] sm:$0xff] }
 0x12e   : > { %1760 = vmatpush1.bf16.msra.mxu1 %v1759_v42  ;;  %v1578_v42 = vld [vmem:[%s2963_s4 + $0x3d0] sm:$0xff]  ;;  %1856 = vmatpush1.bf16.msra.mxu0 %v1855_v39 }
 0x12f   : > { %1762 = vmatprep.subr.bf16.mxu1 %v1761_v43  ;;  %v1787_v43 = vpack.c.bf16 %v1578_v42, %v1576_v41  ;;  %1858 = vmatprep.subr.bf16.mxu0 %v1857_v47 }
 0x132   : > { %1764 = vmatpush1.bf16.msra.mxu1 %v1763_v49  ;;  %v1583_v49 = vld [vmem:[%s2963_s4 + $0x3f8] sm:$0xff] }
 0x133   : > { %1766 = vmatprep.subr.bf16.mxu1 %v1765_v50  ;;  %v1580_v50 = vld [vmem:[%s2963_s4 + $0x3e0] sm:$0xff]  ;;  %v1789_v51 = vpack.c.bf16 %v1583_v49, %v1581_v48 }
 0x136   : > { %1768 = vmatpush1.bf16.msra.mxu1 %v1767_v53  ;;  %v1791_v53 = vpack.c.bf16 %v1582_v46, %v1580_v50 }
 0x137   : > { %1770 = vmatprep.subr.bf16.mxu1 %v1769_v56  ;;  %v740_v56 = vld [vmem:[%s2962_s3] sm:$0x3] }
 0x138   : > { %v745_v57 = vrot.slane %v740_v56, %v744_v55 }
 0x13a   : > { %1772 = vmatpush1.bf16.msra.mxu1 %v1771_v58  ;;  %v749_v58 = vrot.slane %v740_v56, %v748_v52 }
 0x13b   : > { %1774 = vmatprep.subr.bf16.mxu1 %v1773_v7 }
 0x13e   : > { %1776 = vmatpush1.bf16.msra.mxu1 %v1775_v8 }
 0x13f   : > { %1778 = vmatprep.subr.bf16.mxu1 %v1777_v14 }
 0x142   : > { %1780 = vmatpush1.bf16.msra.mxu1 %v1779_v20  ;;  %v2682_v20 = vld [vmem:[%s2963_s4 + $0x420] sm:$0xff] }
 0x143   : > { %1782 = vmatprep.subr.bf16.mxu1 %v1781_v28  ;;  %v1859_v28 = vpack.c.bf16 %v1586_v16, %v1584_v15  ;;  %v1863_v33 = vpack.c.bf16 %v2687_v21, %v2682_v20 }
 0x146   : > { %1784 = vmatpush1.bf16.msra.mxu1 %v1783_v31 }
 0x147   : > { %1786 = vmatprep.subr.bf16.mxu1 %v1785_v40 }
 0x14a   : > { %1788 = vmatpush1.bf16.msra.mxu1 %v1787_v43 }
 0x14b   : > { %1790 = vmatprep.subr.bf16.mxu1 %v1789_v51 }
 0x14e   : > { %1792 = vmatpush1.bf16.msra.mxu1 %v1791_v53 }
 0x1e4   : > { %v709_v59 = vpop.f32.mrb[10].mxu1 }
 0x1e5   : > { %v752_v60 = vadd.f32 %v745_v57, %v709_v59  ;;  %v711_v61 = vpop.f32.mrb[11].mxu1 }
 0x1e6   : > { %v753_v62 = vadd.f32 %v749_v58, %v711_v61 }
 0x1e7   : > { %v760_v0 = vmax.f32 %v752_v60, 0.0 }
 0x1e8   : > { %v761_v2 = vmax.f32 %v753_v62, 0.0  ;;  %v715_v3 = vpop.f32.mrb[12].mxu1 }
 0x1e9   : > { %v786_v4 = vrot.slane %v760_v0, 7  ;;  %v754_v5 = vadd.f32 %v745_v57, %v715_v3  ;;  %v717_v6 = vpop.f32.mrb[13].mxu1  ;;  %v1594_v3 = vld [vmem:[%s2963_s4 + $0x450] sm:$0xff] }
 0x1ea   : > { %v787_v7 = vrot.slane %v761_v2, 7  ;;  %v755_v8 = vadd.f32 %v749_v58, %v717_v6  ;;  %v1592_v2 = vld [vmem:[%s2963_s4 + $0x440] sm:$0xff]  ;;  %v1597_v6 = vld [vmem:[%s2963_s4 + $0x468] sm:$0xff] }
 0x1eb   : > { %810 = vst [vmem:[#allocation2] sm:$0xfe] %v786_v4  ;;  %v762_v9 = vmax.f32 %v754_v5, 0.0 }
 0x1ec   : > { %811 = vst [vmem:[#allocation2 + $0x8] sm:$0xfe] %v787_v7  ;;  %v763_v10 = vmax.f32 %v755_v8, 0.0  ;;  %v721_v11 = vpop.f32.mrb[14].mxu1 }
 0x1ed   : > { %v788_v63 = vrot.slane %v762_v9, 7  ;;  %v756_v12 = vadd.f32 %v745_v57, %v721_v11  ;;  %v723_v13 = vpop.f32.mrb[15].mxu1 }
 0x1ee   : > { %v790_v14 = vrot.slane %v763_v10, 7  ;;  %v757_v18 = vadd.f32 %v749_v58, %v723_v13  ;;  %v1867_v13 = vpack.c.bf16 %v1594_v3, %v1592_v2  ;;  %v1618_v2 = vld [vmem:[%s2963_s4 + $0x510] sm:$0xff]  ;;  %v1621_v3 = vld [vmem:[%s2963_s4 + $0x528] sm:$0xff] }
 0x1ef   : > { %v2690_v22 = vsel %vm785_vm6, %v786_v4, %v788_v63  ;;  %v764_v23 = vmax.f32 %v756_v12, 0.0 }
 0x1f0   : > { %v2703_v25 = vsel %vm785_vm6, %v787_v7, %v790_v14  ;;  %v765_v26 = vmax.f32 %v757_v18, 0.0  ;;  %v727_v27 = vpop.f32.mrb[16].mxu1  ;;  %v972_v36 = vrot.slane %v2690_v22, 1  ;;  %v1249_v62 = vrot.slane %v2690_v22, 2  ;;  %v1599_v7 = vld [vmem:[%s2963_s4 + $0x478] sm:$0xff]  ;;  %v1596_v18 = vld [vmem:[%s2963_s4 + $0x460] sm:$0xff] }
 0x1f1   : > { %v792_v29 = vrot.slane %v764_v23, 7  ;;  %v758_v30 = vadd.f32 %v745_v57, %v727_v27  ;;  %v729_v31 = vpop.f32.mrb[17].mxu1  ;;  %v975_v42 = vrot.slane %v2703_v25, 1  ;;  %v1252_v51 = vrot.slane %v2703_v25, 2  ;;  %v1601_v23 = vld [vmem:[%s2963_s4 + $0x488] sm:$0xff] }
 0x1f2   : > { %v794_v34 = vrot.slane %v765_v26, 7  ;;  %v759_v35 = vadd.f32 %v749_v58, %v729_v31  ;;  %v892_v38 = vld [vmem:[#allocation2] sm:$0xfe]  ;;  %v1871_v26 = vpack.c.bf16 %v1598_v19, %v1596_v18  ;;  %v1626_v19 = vld [vmem:[%s2963_s4 + $0x550] sm:$0xff] }
 0x1f3   : > { %v793_v39 = vsel %vm785_vm6, %v788_v63, %v792_v29  ;;  %v766_v40 = vmax.f32 %v758_v30, 0.0  ;;  %v821_v41 = vld [vmem:[#allocation2 + $0x8] sm:$0xff]  ;;  %v971_v44 = vrot.slane %v892_v38, 1  ;;  %v820_v48 = vld [vmem:[#allocation2] sm:$0xff]  ;;  %v1602_v30 = vld [vmem:[%s2963_s4 + $0x490] sm:$0xff] }
 0x1f4   : > { %v893_v43 = vld [vmem:[#allocation2 + $0x8] sm:$0xfe]  ;;  %v795_v45 = vsel %vm785_vm6, %v790_v14, %v794_v34  ;;  %v767_v47 = vmax.f32 %v759_v35, 0.0  ;;  %1150 = vmatprep.mubr.f32.mxu0 %v821_v41  ;;  %v977_v50 = vrot.slane %v793_v39, 1  ;;  %v1254_v59 = vrot.slane %v793_v39, 2  ;;  %v1607_v35 = vld [vmem:[%s2963_s4 + $0x4b8] sm:$0xff] }
 0x1f5   : > { %v974_v49 = vrot.slane %v893_v43, 1  ;;  %v796_v46 = vrot.slane %v766_v40, 7  ;;  %1151 = vmatmul.mubr.f32.vlgmr.msra.gmra.mrb[0].mxu0 %v820_v48  ;;  %v979_v53 = vrot.slane %v795_v45, 1  ;;  %v1256_v56 = vrot.slane %v795_v45, 2  ;;  %v1176_v15 = vld [vmem:[#allocation2 + $0x8] sm:$0xfc] }
 0x1f6   : > { %v798_v57 = vrot.slane %v767_v47, 7  ;;  %1860 = vmatpush1.bf16.msra.mxu0 %v1859_v28  ;;  %1156 = vmatprep.mubr.f32.mxu0 %v2703_v25  ;;  %v978_v60 = vsel %vm403_vm2, %v972_v36, %v977_v50  ;;  %v973_v0 = vsel %vm403_vm2, %v971_v44, %v972_v36  ;;  %v2751_v12 = vsel %vm625_vm3, %v1249_v62, %v1254_v59  ;;  %v1604_v41 = vld [vmem:[%s2963_s4 + $0x4a0] sm:$0xff]  ;;  %v1606_v25 = vld [vmem:[%s2963_s4 + $0x4b0] sm:$0xff]  ;;  %v1611_v43 = vld [vmem:[%s2963_s4 + $0x4d8] sm:$0xff] }
 0x1f7   : > { %v976_v58 = vsel %vm403_vm2, %v974_v49, %v975_v42  ;;  %v2718_v61 = vsel %vm785_vm6, %v792_v29, %v796_v46  ;;  %818 = vst [vmem:[#allocation2 + $0x40] sm:$0x1] %v796_v46  ;;  %1862 = vmatprep.subr.bf16.mxu0 %v1861_v32  ;;  %v980_v4 = vsel %vm403_vm2, %v975_v42, %v979_v53  ;;  %v1251_v1 = vrot.slane %v1176_v15, 2  ;;  %v1600_v29 = vld [vmem:[%s2963_s4 + $0x480] sm:$0xff]  ;;  %v1609_v42 = vld [vmem:[%s2963_s4 + $0x4c8] sm:$0xff]  ;;  %v1610_v48 = vld [vmem:[%s2963_s4 + $0x4d0] sm:$0xff] }
 0x1f8   : > { %1061 = vmatprep.mubr.f32.mxu1 %v976_v58  ;;  %v2730_v5 = vsel %vm785_vm6, %v794_v34, %v798_v57  ;;  %819 = vst [vmem:[#allocation2 + $0x48] sm:$0x1] %v798_v57  ;;  %v981_v8 = vrot.slane %v2718_v61, 1  ;;  %v1258_v9 = vrot.slane %v2718_v61, 2  ;;  %v2743_v10 = vsel %vm625_vm3, %v1252_v51, %v1256_v56  ;;  %v1605_v34 = vld [vmem:[%s2963_s4 + $0x4a8] sm:$0xff]  ;;  %v1608_v47 = vld [vmem:[%s2963_s4 + $0x4c0] sm:$0xff] }
 0x1f9   : > { %1062 = vmatmul.mubr.f32.vlgmr.msra.gmra.mrb[18].mxu1 %v973_v0  ;;  %1157 = vmatmul.mubr.f32.gmra.mrb[2].mxu0 %v2690_v22  ;;  %v983_v11 = vrot.slane %v2730_v5, 1  ;;  %v1260_v63 = vrot.slane %v2730_v5, 2  ;;  %v1869_v14 = vpack.c.bf16 %v1599_v7, %v1597_v6  ;;  %v1873_v28 = vpack.c.bf16 %v1603_v24, %v1601_v23  ;;  %v1613_v49 = vld [vmem:[%s2963_s4 + $0x4e8] sm:$0xff]  ;;  %v1619_v58 = vld [vmem:[%s2963_s4 + $0x518] sm:$0xff]  ;;  %v1616_v0 = vld [vmem:[%s2963_s4 + $0x500] sm:$0xff] }
 0x1fa   : > { %1067 = vmatprep.mubr.f32.mxu1 %v980_v4  ;;  %1864 = vmatpush1.bf16.msra.mxu0 %v1863_v33  ;;  %v982_v16 = vsel %vm403_vm2, %v977_v50, %v981_v8  ;;  %v2757_v17 = vsel %vm625_vm3, %v1254_v59, %v1258_v9  ;;  %v1253_v36 = vsel %vm625_vm3, %v1251_v1, %v1252_v51  ;;  %v1615_v50 = vld [vmem:[%s2963_s4 + $0x4f8] sm:$0xff]  ;;  %v1617_v57 = vld [vmem:[%s2963_s4 + $0x508] sm:$0xff]  ;;  %v1624_v18 = vld [vmem:[%s2963_s4 + $0x540] sm:$0xff] }
 0x1fb   : > { %1162 = vmatprep.mubr.f32.mxu0 %v795_v45  ;;  %1866 = vmatprep.subr.bf16.mxu0 %v1865_v37  ;;  %v984_v20 = vsel %vm403_vm2, %v979_v53, %v983_v11  ;;  %v2769_v21 = vsel %vm625_vm3, %v1256_v56, %v1260_v63  ;;  %v1875_v37 = vpack.c.bf16 %v1602_v30, %v1600_v29  ;;  %v1612_v53 = vld [vmem:[%s2963_s4 + $0x4e0] sm:$0xff]  ;;  %v1614_v56 = vld [vmem:[%s2963_s4 + $0x4f0] sm:$0xff]  ;;  %v1623_v4 = vld [vmem:[%s2963_s4 + $0x538] sm:$0xff] }
 0x1fc   : > { %v1879_v44 = vpack.c.bf16 %v1606_v25, %v1604_v41  ;;  %v1881_v45 = vpack.c.bf16 %v1611_v43, %v1609_v42  ;;  %v1883_v46 = vpack.c.bf16 %v1610_v48, %v1608_v47  ;;  %v1885_v51 = vpack.c.bf16 %v1615_v50, %v1613_v49  ;;  %v1627_v15 = vld [vmem:[%s2963_s4 + $0x558] sm:$0xff]  ;;  %v1640_v43 = vld [vmem:[%s2963_s4 + $0x5c0] sm:$0xff] }
 0x1fd   : > { %1068 = vmatmul.mubr.f32.gmra.mrb[20].mxu1 %v978_v60  ;;  %1163 = vmatmul.mubr.f32.gmra.mrb[4].mxu0 %v793_v39  ;;  %v1877_v39 = vpack.c.bf16 %v1607_v35, %v1605_v34  ;;  %v1887_v59 = vpack.c.bf16 %v1614_v56, %v1612_v53  ;;  %v1889_v60 = vpack.c.bf16 %v1619_v58, %v1617_v57  ;;  %v1631_v23 = vld [vmem:[%s2963_s4 + $0x578] sm:$0xff]  ;;  %v1637_v34 = vld [vmem:[%s2963_s4 + $0x5a8] sm:$0xff]  ;;  %v1644_v50 = vld [vmem:[%s2963_s4 + $0x5e0] sm:$0xff] }
 0x1fe   : > { %1073 = vmatprep.mubr.f32.mxu1 %v984_v20  ;;  %1868 = vmatpush1.bf16.msra.mxu0 %v1867_v13  ;;  %v894_v27 = vld [vmem:[#allocation2 + $0x40] sm:$0x1]  ;;  %v1891_v6 = vpack.c.bf16 %v1618_v2, %v1616_v0  ;;  %v1893_v7 = vpack.c.bf16 %v1623_v4, %v1621_v3  ;;  %v1625_v13 = vld [vmem:[%s2963_s4 + $0x548] sm:$0xff]  ;;  %v1899_v24 = vpack.c.bf16 %v1626_v19, %v1624_v18  ;;  %v1635_v29 = vld [vmem:[%s2963_s4 + $0x598] sm:$0xff] }
 0x1ff   : > { %1168 = vmatprep.mubr.f32.mxu0 %v2730_v5  ;;  %1870 = vmatprep.subr.bf16.mxu0 %v1869_v14  ;;  %v895_v31 = vld [vmem:[#allocation2 + $0x48] sm:$0x1]  ;;  %v985_v32 = vrot.slane %v894_v27, 1  ;;  %v1897_v14 = vpack.c.bf16 %v1627_v15, %v1625_v13  ;;  %v1630_v27 = vld [vmem:[%s2963_s4 + $0x570] sm:$0xff]  ;;  %v1639_v35 = vld [vmem:[%s2963_s4 + $0x5b8] sm:$0xff] }
 0x200   : > { %v987_v33 = vrot.slane %v895_v31, 1  ;;  %v1629_v20 = vld [vmem:[%s2963_s4 + $0x568] sm:$0xff]  ;;  %v1643_v41 = vld [vmem:[%s2963_s4 + $0x5d8] sm:$0xff]  ;;  %v1371_v5 = vld [vmem:[%s2964_s5] sm:$0x3] }
 0x201   : > { %1074 = vmatmul.mubr.f32.gmra.mrb[22].mxu1 %v982_v16  ;;  %1169 = vmatmul.mubr.f32.gmra.mrb[6].mxu0 %v2718_v61  ;;  %v986_v40 = vsel %vm403_vm2, %v981_v8, %v985_v32  ;;  %v1620_v8 = vld [vmem:[%s2963_s4 + $0x520] sm:$0xff]  ;;  %v1901_v1 = vpack.c.bf16 %v1631_v23, %v1629_v20  ;;  %v1647_v47 = vld [vmem:[%s2963_s4 + $0x5f8] sm:$0xff]  ;;  %v1178_v58 = vld [vmem:[#allocation2 + $0x48] sm:$0x3]  ;;  %v1380_v61 = vrot.slane %v1371_v5, %v748_v52 }
 0x202   : > { %1872 = vmatpush1.bf16.msra.mxu0 %v1871_v26  ;;  %1338 = vmatprep.mubr.f32.mxu0 %v1253_v36  ;;  %v988_v38 = vsel %vm403_vm2, %v983_v11, %v987_v33  ;;  %v1622_v11 = vld [vmem:[%s2963_s4 + $0x530] sm:$0xff]  ;;  %v1628_v26 = vld [vmem:[%s2963_s4 + $0x560] sm:$0xff] }
 0x203   : > { %1874 = vmatprep.subr.bf16.mxu0 %v1873_v28  ;;  %1079 = vmatprep.mubr.f32.mxu1 %v988_v38  ;;  %v1895_v16 = vpack.c.bf16 %v1622_v11, %v1620_v8  ;;  %v1633_v28 = vld [vmem:[%s2963_s4 + $0x588] sm:$0xff]  ;;  %v1903_v30 = vpack.c.bf16 %v1630_v27, %v1628_v26  ;;  %v1632_v32 = vld [vmem:[%s2963_s4 + $0x580] sm:$0xff]  ;;  %v1634_v33 = vld [vmem:[%s2963_s4 + $0x590] sm:$0xff] }
 0x204   : > { %v1905_v31 = vpack.c.bf16 %v1635_v29, %v1633_v28  ;;  %v1907_v36 = vpack.c.bf16 %v1634_v33, %v1632_v32  ;;  %v1636_v38 = vld [vmem:[%s2963_s4 + $0x5a0] sm:$0xff] }
 0x205   : > { %1080 = vmatmul.mubr.f32.gmra.mrb[24].mxu1 %v986_v40  ;;  %v1641_v40 = vld [vmem:[%s2963_s4 + $0x5c8] sm:$0xff] }
 0x206   : > { %1876 = vmatpush1.bf16.msra.mxu0 %v1875_v37  ;;  %v1909_v37 = vpack.c.bf16 %v1639_v35, %v1637_v34  ;;  %v1913_v42 = vpack.c.bf16 %v1643_v41, %v1641_v40 }
 0x207   : > { %1878 = vmatprep.subr.bf16.mxu0 %v1877_v39  ;;  %v1638_v39 = vld [vmem:[%s2963_s4 + $0x5b0] sm:$0xff] }
 0x208   : > { %v1911_v25 = vpack.c.bf16 %v1638_v39, %v1636_v38 }
 0x20a   : > { %1880 = vmatpush1.bf16.msra.mxu0 %v1879_v44  ;;  %v1642_v44 = vld [vmem:[%s2963_s4 + $0x5d0] sm:$0xff] }
 0x20b   : > { %1882 = vmatprep.subr.bf16.mxu0 %v1881_v45  ;;  %v1645_v45 = vld [vmem:[%s2963_s4 + $0x5e8] sm:$0xff]  ;;  %v1915_v48 = vpack.c.bf16 %v1642_v44, %v1640_v43 }
 0x20c   : > { %v1917_v49 = vpack.c.bf16 %v1647_v47, %v1645_v45 }
 0x20e   : > { %1884 = vmatpush1.bf16.msra.mxu0 %v1883_v46  ;;  %v1646_v46 = vld [vmem:[%s2963_s4 + $0x5f0] sm:$0xff] }
 0x20f   : > { %1886 = vmatprep.subr.bf16.mxu0 %v1885_v51  ;;  %v1175_v51 = vld [vmem:[#allocation2] sm:$0xfc]  ;;  %v1919_v53 = vpack.c.bf16 %v1646_v46, %v1644_v50 }
 0x210   : > { %v1248_v56 = vrot.slane %v1175_v51, 2 }
 0x212   : > { %1888 = vmatpush1.bf16.msra.mxu0 %v1887_v59  ;;  %v1250_v57 = vsel %vm625_vm3, %v1248_v56, %v1249_v62  ;;  %v1264_v59 = vrot.slane %v1178_v58, 2 }
 0x213   : > { %1890 = vmatprep.subr.bf16.mxu0 %v1889_v60  ;;  %v1177_v60 = vld [vmem:[#allocation2 + $0x40] sm:$0x3] }
 0x214   : > { %v1262_v0 = vrot.slane %v1177_v60, 2  ;;  %v1265_v2 = vsel %vm625_vm3, %v1260_v63, %v1264_v59  ;;  %v1376_v63 = vrot.slane %v1371_v5, %v744_v55 }
 0x216   : > { %1892 = vmatpush1.bf16.msra.mxu0 %v1891_v6  ;;  %v1263_v22 = vsel %vm625_vm3, %v1258_v9, %v1262_v0 }
 0x217   : > { %1894 = vmatprep.subr.bf16.mxu0 %v1893_v7 }
 0x21a   : > { %1896 = vmatpush1.bf16.msra.mxu0 %v1895_v16 }
 0x21b   : > { %1898 = vmatprep.subr.bf16.mxu0 %v1897_v14 }
 0x21e   : > { %1900 = vmatpush1.bf16.msra.mxu0 %v1899_v24 }
 0x21f   : > { %1902 = vmatprep.subr.bf16.mxu0 %v1901_v1 }
 0x222   : > { %1904 = vmatpush1.bf16.msra.mxu0 %v1903_v30 }
 0x223   : > { %1906 = vmatprep.subr.bf16.mxu0 %v1905_v31 }
 0x226   : > { %1908 = vmatpush1.bf16.msra.mxu0 %v1907_v36 }
 0x227   : > { %1910 = vmatprep.subr.bf16.mxu0 %v1909_v37 }
 0x22a   : > { %1912 = vmatpush1.bf16.msra.mxu0 %v1911_v25 }
 0x22b   : > { %1914 = vmatprep.subr.bf16.mxu0 %v1913_v42 }
 0x22e   : > { %1916 = vmatpush1.bf16.msra.mxu0 %v1915_v48 }
 0x22f   : > { %1918 = vmatprep.subr.bf16.mxu0 %v1917_v49 }
 0x232   : > { %1920 = vmatpush1.bf16.msra.mxu0 %v1919_v53 }
 0x235   : > { %1339 = vmatmul.mubr.f32.vlgmr.msra.gmra.mrb[0].mxu0 %v1250_v57 }
 0x236   : > { %1344 = vmatprep.mubr.f32.mxu0 %v2743_v10 }
 0x239   : > { %1345 = vmatmul.mubr.f32.gmra.mrb[2].mxu0 %v2751_v12 }
 0x23a   : > { %1350 = vmatprep.mubr.f32.mxu0 %v2769_v21 }
 0x23d   : > { %1351 = vmatmul.mubr.f32.gmra.mrb[4].mxu0 %v2757_v17 }
 0x23e   : > { %1356 = vmatprep.mubr.f32.mxu0 %v1265_v2 }
 0x241   : > { %1357 = vmatmul.mubr.f32.gmra.mrb[6].mxu0 %v1263_v22 }
 0x2cc   : > { %v1063_v62 = vpop.f32.mrb[18].mxu1 }
 0x2cd   : > { %v1065_v10 = vpop.f32.mrb[19].mxu1 }
 0x2d0   : > { %v1069_v12 = vpop.f32.mrb[20].mxu1 }
 0x2d1   : > { %v1071_v3 = vpop.f32.mrb[21].mxu1 }
 0x2d4   : > { %v1075_v4 = vpop.f32.mrb[22].mxu1 }
 0x2d5   : > { %v1077_v21 = vpop.f32.mrb[23].mxu1 }
 0x2d8   : > { %v1081_v6 = vpop.f32.mrb[24].mxu1 }
 0x2d9   : > { %v1083_v7 = vpop.f32.mrb[25].mxu1 }
 0x308   : > { %v1340_v17 = vpop.f32.mrb[0].mxu0 }
 0x309   : > { %v1921_v9 = vadd.f32 %v1340_v17, %v1063_v62  ;;  %v1342_v8 = vpop.f32.mrb[1].mxu0 }
 0x30a   : > { %v1922_v11 = vadd.f32 %v1342_v8, %v1065_v10 }
 0x30b   : > { %v1383_v13 = vadd.f32 %v1921_v9, %v1376_v63 }
 0x30c   : > { %v1384_v15 = vadd.f32 %v1922_v11, %v1380_v61  ;;  %v1346_v16 = vpop.f32.mrb[2].mxu0 }
 0x30d   : > { %v1391_v55 = vmax.f32 %v1383_v13, 0.0  ;;  %v1923_v14 = vadd.f32 %v1346_v16, %v1069_v12  ;;  %v1348_v54 = vpop.f32.mrb[3].mxu0 }
 0x30e   : > { %v1392_v52 = vmax.f32 %v1384_v15, 0.0  ;;  %v1924_v18 = vadd.f32 %v1348_v54, %v1071_v3 }
 0x30f   : > { %1399 = vst [vmem:[%s2946_s16] sm:$0xff] %v1391_v55  ;;  %v1385_v19 = vadd.f32 %v1923_v14, %v1376_v63 }
 0x310   : > { %1400 = vst [vmem:[%s2946_s16 + $0x8] sm:$0xff] %v1392_v52  ;;  %v1386_v20 = vadd.f32 %v1924_v18, %v1380_v61  ;;  %v1352_v23 = vpop.f32.mrb[4].mxu0 }
 0x311   : > { %v1393_v24 = vmax.f32 %v1385_v19, 0.0  ;;  %v1925_v1 = vadd.f32 %v1352_v23, %v1075_v4  ;;  %v1354_v26 = vpop.f32.mrb[5].mxu0 }
 0x312   : > { %v1394_v27 = vmax.f32 %v1386_v20, 0.0  ;;  %v1926_v28 = vadd.f32 %v1354_v26, %v1077_v21 }
 0x313   : > { %1401 = vst [vmem:[%s2946_s16 + $0x10] sm:$0xff] %v1393_v24  ;;  %v1387_v29 = vadd.f32 %v1925_v1, %v1376_v63 }
 0x314   : > { %1402 = vst [vmem:[%s2946_s16 + $0x18] sm:$0xff] %v1394_v27  ;;  %v1388_v30 = vadd.f32 %v1926_v28, %v1380_v61  ;;  %v1358_v31 = vpop.f32.mrb[6].mxu0 }
 0x315   : > { %v1395_v32 = vmax.f32 %v1387_v29, 0.0  ;;  %v1927_v33 = vadd.f32 %v1358_v31, %v1081_v6  ;;  %v1360_v34 = vpop.f32.mrb[7].mxu0 }
 0x316   : > { %v1396_v35 = vmax.f32 %v1388_v30, 0.0  ;;  %v1928_v36 = vadd.f32 %v1360_v34, %v1083_v7 }
 0x317   : > { %1403 = vst [vmem:[%s2946_s16 + $0x20] sm:$0xff] %v1395_v32  ;;  %v1389_v37 = vadd.f32 %v1927_v33, %v1376_v63 }
 0x318   : > { %1404 = vst [vmem:[%s2946_s16 + $0x28] sm:$0xff] %v1396_v35  ;;  %v1390_v38 = vadd.f32 %v1928_v36, %v1380_v61 }
 0x319   : > { %v1397_v39 = vmax.f32 %v1389_v37, 0.0 }
 0x31a   : > { %v1398_v40 = vmax.f32 %v1390_v38, 0.0 }
 0x31b   : > { %1405 = vst [vmem:[%s2946_s16 + $0x30] sm:$0xff] %v1397_v39 }
 0x31c   : > { %1406 = vst [vmem:[%s2946_s16 + $0x38] sm:$0xff] %v1398_v40 }
 0x31d PF: > { %s16_s21 = sadd.s32 1, %s1970_s21  }
 0x31e   : > { %p13_p4 = scmp.ge.s32.totalorder %s16_s21, 4  }
 0x320   :  { %15 = sbr.rel (!%p13_p4) target bundleno = 1 (0x1), region = 79 }

</bundles_post_ra>
